<compile_context>
chip_gen: v5e
topology: v5e:2x2
jax: 0.10.0
libtpu: 0.0.40
codegen_flags: <defaults>
</compile_context>

<pallas_src>
import jax
import jax.numpy as jnp
from jax.experimental import pallas as pl
from jax.experimental.pallas import tpu as pltpu


# --------------------------------------------------------------------------
# Path 1 (default): aliased zero-copy identity.
# --------------------------------------------------------------------------
def _alias_passthrough_kernel(text_ref, cellid_ref, text_out_ref, cellid_out_ref,
                              flag_ref):
    # Outputs alias the inputs via input_output_aliases, and all operands live
    # in pl.ANY (HBM) memory space, so no HBM<->VMEM DMA is emitted at all.
    # The tiny SMEM write below just keeps the kernel body non-degenerate.
    del text_ref, cellid_ref, text_out_ref, cellid_out_ref
    flag_ref[0] = jnp.int32(1)


def _dual_encoding_aliased(text_feat: jax.Array, cellid: jax.Array):
    return pl.pallas_call(
        _alias_passthrough_kernel,
        out_shape=(
            jax.ShapeDtypeStruct(text_feat.shape, text_feat.dtype),
            jax.ShapeDtypeStruct(cellid.shape, cellid.dtype),
        ),
        in_specs=[
            pl.BlockSpec(memory_space=pl.ANY),
            pl.BlockSpec(memory_space=pl.ANY),
        ],
        out_specs=(
            pl.BlockSpec(memory_space=pl.ANY),
            pl.BlockSpec(memory_space=pl.ANY),
        ),
        scratch_shapes=[pltpu.SMEM((1,), jnp.int32)],
        # Identity op: each output aliases its input -> ~zero data movement.
        input_output_aliases={0: 0, 1: 1},
    )(text_feat, cellid)


# --------------------------------------------------------------------------
# Path 2 (optional): materializing, batch-tiled pipelined copy.
# --------------------------------------------------------------------------
def _copy_kernel(text_ref, cellid_ref, text_out_ref, cellid_out_ref):
    text_out_ref[...] = text_ref[...]
    cellid_out_ref[...] = cellid_ref[...]


def _pick_batch_tile(b: int, row_bytes: int, budget_bytes: int = 2 << 20) -> int:
    """Largest multiple-of-8 (power-of-two * 8) divisor of `b` whose per-tile
    footprint stays within a conservative per-buffer VMEM budget.

    Budget is v7x-safe: 64 MiB physical / ~32 MiB scoped VMEM, with 2 inputs +
    2 outputs double-buffered by the pipeline.  Falls back to a single
    full-array block when the batch is not a multiple of 8 (always legal)."""
    if b % 8 != 0:
        return b
    cap_rows = max(8, budget_bytes // max(row_bytes, 1))
    tb = 8
    cand = 8
    while cand <= min(b, cap_rows):
        if b % cand == 0:
            tb = cand
        cand *= 2
    return tb


def _dual_encoding_copy(text_feat: jax.Array, cellid: jax.Array, *, batch_tile=None):
    b, ht = text_feat.shape
    _, hc = cellid.shape
    itemsize = max(jnp.dtype(text_feat.dtype).itemsize,
                   jnp.dtype(cellid.dtype).itemsize)
    row_bytes = (ht + hc) * itemsize
    tb = batch_tile if batch_tile is not None else _pick_batch_tile(b, row_bytes)
    if tb != b:
        assert b % tb == 0 and tb % 8 == 0, (
            "batch tile must divide batch and be a multiple of 8")
    grid = (b // tb,)

    # Note: for production shapes, presenting a lane-dense last dim (multiple
    # of 128) via a wrapper reshape raises achieved HBM bandwidth further; at
    # the module's tiny hidden/cell dims the default aliased path is the win.
    return pl.pallas_call(
        _copy_kernel,
        out_shape=(
            jax.ShapeDtypeStruct(text_feat.shape, text_feat.dtype),
            jax.ShapeDtypeStruct(cellid.shape, cellid.dtype),
        ),
        grid=grid,
        in_specs=[
            pl.BlockSpec((tb, ht), lambda i: (i, 0)),
            pl.BlockSpec((tb, hc), lambda i: (i, 0)),
        ],
        out_specs=(
            pl.BlockSpec((tb, ht), lambda i: (i, 0)),
            pl.BlockSpec((tb, hc), lambda i: (i, 0)),
        ),
        compiler_params=pltpu.CompilerParams(
            # Batch tiles are independent -> shard across v7x's 2 TensorCores.
            dimension_semantics=("parallel",),
        ),
    )(text_feat, cellid)


# --------------------------------------------------------------------------
# Public wrapper: GeneralModel.get_dual_encoding
# --------------------------------------------------------------------------
def get_dual_encoding(text_feat: jax.Array, cellid: jax.Array, *,
                      materialize: bool = False, batch_tile=None):
    """Pallas implementation of GeneralModel.get_dual_encoding (identity pair).

    materialize=False (default): outputs alias the inputs (zero HBM traffic).
    materialize=True: outputs are fresh buffers written by a batch-tiled,
    double-buffered VMEM copy (use when downstream code must not alias).
    """
    assert text_feat.ndim == 2 and cellid.ndim == 2
    assert text_feat.shape[0] == cellid.shape[0]
    if materialize:
        return _dual_encoding_copy(text_feat, cellid, batch_tile=batch_tile)
    return _dual_encoding_aliased(text_feat, cellid)


if __name__ == "__main__":
    key = jax.random.PRNGKey(0)
    k1, k2, k3, k4 = jax.random.split(key, 4)

    # Small shapes consistent with the module's (text_feat, cellid) pair.
    batch, hidden, cell_dim = 2, 32, 16
    text_feat = jax.random.normal(k1, (batch, hidden), dtype=jnp.float32)
    cellid = jax.random.normal(k2, (batch, cell_dim), dtype=jnp.float32)

    # Primary path: aliased zero-copy identity.
    text_out, cell_out = get_dual_encoding(text_feat, cellid)
    jax.block_until_ready((text_out, cell_out))
    assert text_out.shape == text_feat.shape and text_out.dtype == text_feat.dtype
    assert cell_out.shape == cellid.shape and cell_out.dtype == cellid.dtype
    assert bool(jnp.all(text_out == text_feat))
    assert bool(jnp.all(cell_out == cellid))

    # Secondary path: materializing tiled copy, exercised at a shape where the
    # batch axis actually tiles (multiple-of-8 tile, lane-dense last dims).
    batch2, hidden2, cell_dim2 = 64, 256, 128
    text2 = jax.random.normal(k3, (batch2, hidden2), dtype=jnp.float32)
    cell2 = jax.random.normal(k4, (batch2, cell_dim2), dtype=jnp.float32)
    t2, c2 = get_dual_encoding(text2, cell2, materialize=True, batch_tile=8)
    jax.block_until_ready((t2, c2))
    assert t2.shape == text2.shape and c2.shape == cell2.shape
    assert bool(jnp.all(t2 == text2))
    assert bool(jnp.all(c2 == cell2))

    print("KERNEL_OK")
</pallas_src>

<mosaic_0001>
module attributes {stable_mosaic.version = 11 : i64} {
  func.func @_alias_passthrough_kernel(%arg0: memref<2x32xf32, #tpu.memory_space<any>>, %arg1: memref<2x16xf32, #tpu.memory_space<any>>, %arg2: memref<2x32xf32, #tpu.memory_space<any>>, %arg3: memref<2x16xf32, #tpu.memory_space<any>>, %arg4: memref<1xi32, #tpu.memory_space<smem>>) attributes {dimension_semantics = [], scalar_prefetch = 0 : i64, scratch_operands = 1 : i64, tpu.core_type = #tpu.core_type<tc>} {
    %c1_i32 = arith.constant 1 : i32
    %c0 = arith.constant 0 : index
    %0 = memref.load %arg4[%c0] : memref<1xi32, #tpu.memory_space<smem>>
    memref.store %c1_i32, %arg4[%c0] : memref<1xi32, #tpu.memory_space<smem>>
    return
  }
}

</mosaic_0001>

<bundles_post_ra>
// kernel: tpu_custom_call.1
= control target key start
LH: loop header
LB: loop body
LE: loop exit
PB: predicated region body
PF: predicated region fallthrough
CT: control target
= control target key end

     0   :  { %s31_s0 = inlined_call_operand.hbm [shape: f32[2,32], index: 0, kind: input, shape index: {}, may-alias: {0,2}]   ;;  %s32_s1 = inlined_call_operand.hbm [shape: f32[2,16], index: 1, kind: input, shape index: {}, may-alias: {1,3}]   ;;  %s33_s2 = inlined_call_operand.hbm [shape: f32[2,32], index: 2, kind: output, shape index: {0}, may-alias: {0,2}]   ;;  %s34_s3 = inlined_call_operand.hbm [shape: f32[2,16], index: 3, kind: output, shape index: {1}, may-alias: {1,3}]  }

</bundles_post_ra>
